<compile_context>
chip_gen: v7x
topology: tpu7x:2x2x1
jax: 0.10.0
libtpu: 0.0.40
codegen_flags: <defaults>
</compile_context>

<pallas_src>
import functools

import jax
import jax.numpy as jnp
from jax.experimental import pallas as pl
from jax.experimental.pallas import tpu as pltpu


def _round_up(x, m):
    return (x + m - 1) // m * m


# ----------------------------------------------------------------------------
# Fused Pallas kernel: both FCN heads as one 3-matmul MLP over packed weights.
# ----------------------------------------------------------------------------
def _mlp3_kernel(x_ref, w1_ref, b1_ref, w2_ref, b2_ref, w3_ref, b3_ref, o_ref):
    x = x_ref[...]
    h1 = jnp.tanh(
        jnp.dot(x, w1_ref[...], preferred_element_type=jnp.float32) + b1_ref[...]
    )
    h2 = jnp.tanh(
        jnp.dot(h1, w2_ref[...], preferred_element_type=jnp.float32) + b2_ref[...]
    )
    out = jnp.dot(h2, w3_ref[...], preferred_element_type=jnp.float32) + b3_ref[...]
    o_ref[...] = out.astype(o_ref.dtype)


def _mlp3_pallas(x, params, *, batch_tile=512):
    """Run the fused (action+value) MLP. x: (B_pad, F_pad) padded, lane-dense."""
    w1, b1, w2, b2, w3, b3 = params
    bpad, fpad = x.shape
    out_pad = w3.shape[1]

    if bpad <= batch_tile:
        # Small batch: no grid, full-extent blocks, everything VMEM-resident.
        return pl.pallas_call(
            _mlp3_kernel,
            out_shape=jax.ShapeDtypeStruct((bpad, out_pad), jnp.float32),
        )(x, w1, b1, w2, b2, w3, b3)

    # Large batch: tile the batch axis ("parallel" -> megacore sharding),
    # weights stay VMEM-resident across steps via constant index_maps.
    assert bpad % batch_tile == 0 and batch_tile % 8 == 0
    const2 = lambda i: (0, 0)
    return pl.pallas_call(
        _mlp3_kernel,
        out_shape=jax.ShapeDtypeStruct((bpad, out_pad), jnp.float32),
        grid=(bpad // batch_tile,),
        in_specs=[
            pl.BlockSpec((batch_tile, fpad), lambda i: (i, 0)),
            pl.BlockSpec(w1.shape, const2),
            pl.BlockSpec(b1.shape, const2),
            pl.BlockSpec(w2.shape, const2),
            pl.BlockSpec(b2.shape, const2),
            pl.BlockSpec(w3.shape, const2),
            pl.BlockSpec(b3.shape, const2),
        ],
        out_specs=pl.BlockSpec((batch_tile, out_pad), lambda i: (i, 0)),
        compiler_params=pltpu.CompilerParams(
            dimension_semantics=("parallel",),
        ),
    )(x, w1, b1, w2, b2, w3, b3)


# ----------------------------------------------------------------------------
# Parameter construction (synthetic, deterministic) and block-diagonal packing
# ----------------------------------------------------------------------------
def _init_fcn_params(key, in_dim, hidden, out_dim):
    def linear(k, fan_in, fan_out):
        kw, kb = jax.random.split(k)
        w = jax.random.normal(kw, (fan_in, fan_out), jnp.float32) / jnp.sqrt(
            jnp.float32(fan_in)
        )
        b = 0.01 * jax.random.normal(kb, (1, fan_out), jnp.float32)
        return w, b

    k1, k2, k3 = jax.random.split(key, 3)
    w1, b1 = linear(k1, in_dim, hidden)
    w2, b2 = linear(k2, hidden, hidden)
    w3, b3 = linear(k3, hidden, out_dim)
    return (w1, b1, w2, b2, w3, b3)


def _pack_params(action_params, value_params, own_dim, flat_dim, num_outputs, hidden):
    """Pack both heads block-diagonally with 128-lane padding.

    Input layout expected by the packed W1: columns [0, own_dim) = own_obs,
    columns [own_dim, own_dim+flat_dim) = obs_flat, rest zero.
    Output layout: lanes [0, num_outputs) = action logits, lane num_outputs = value.
    """
    w1a, b1a, w2a, b2a, w3a, b3a = action_params
    w1v, b1v, w2v, b2v, w3v, b3v = value_params

    hp = _round_up(hidden, 128)                 # per-head padded hidden
    fpad = _round_up(own_dim + flat_dim, 128)   # packed input lanes
    outp = _round_up(num_outputs + 1, 128)      # lane-dense output

    w1 = jnp.zeros((fpad, 2 * hp), jnp.float32)
    w1 = w1.at[:own_dim, :hidden].set(w1a)                                   # action
    w1 = w1.at[own_dim:own_dim + flat_dim, hp:hp + hidden].set(w1v)          # value
    b1 = jnp.zeros((1, 2 * hp), jnp.float32)
    b1 = b1.at[:, :hidden].set(b1a)
    b1 = b1.at[:, hp:hp + hidden].set(b1v)

    w2 = jnp.zeros((2 * hp, 2 * hp), jnp.float32)
    w2 = w2.at[:hidden, :hidden].set(w2a)
    w2 = w2.at[hp:hp + hidden, hp:hp + hidden].set(w2v)
    b2 = jnp.zeros((1, 2 * hp), jnp.float32)
    b2 = b2.at[:, :hidden].set(b2a)
    b2 = b2.at[:, hp:hp + hidden].set(b2v)

    w3 = jnp.zeros((2 * hp, outp), jnp.float32)
    w3 = w3.at[:hidden, :num_outputs].set(w3a)
    w3 = w3.at[hp:hp + hidden, num_outputs:num_outputs + 1].set(w3v)
    b3 = jnp.zeros((1, outp), jnp.float32)
    b3 = b3.at[:, :num_outputs].set(b3a)
    b3 = b3.at[:, num_outputs:num_outputs + 1].set(b3v)

    return (w1, b1, w2, b2, w3, b3)


def _fused_forward(own_obs, obs_flat, packed_params, *, own_dim, flat_dim,
                   num_outputs, batch_tile):
    """Pack inputs, run the single fused kernel, slice logits + value."""
    b = own_obs.shape[0]
    fpad = packed_params[0].shape[0]
    bpad = _round_up(b, 8)
    if bpad > batch_tile:
        bpad = _round_up(b, batch_tile)

    x = jnp.zeros((bpad, fpad), jnp.float32)
    x = x.at[:b, :own_dim].set(own_obs.astype(jnp.float32))
    x = x.at[:b, own_dim:own_dim + flat_dim].set(obs_flat.astype(jnp.float32))

    out = _mlp3_pallas(x, packed_params, batch_tile=batch_tile)
    logits = out[:b, :num_outputs]
    value = out[:b, num_outputs]      # already flat -> value_function() shape (B,)
    return logits, value


class CentralizedCriticModelPallas:
    """JAX/Pallas port of CustomTorchCentralizedCriticModel (both heads fused)."""

    def __init__(self, own_obs_dim, obs_flat_dim, num_outputs, hidden=32, seed=0,
                 batch_tile=512):
        key = jax.random.PRNGKey(seed)
        k_action, k_value = jax.random.split(key)
        # action_model: FCN(own_obs -> num_outputs); value_model: FCN(obs_flat -> 1)
        self.action_params = _init_fcn_params(k_action, own_obs_dim, hidden, num_outputs)
        self.value_params = _init_fcn_params(k_value, obs_flat_dim, hidden, 1)
        self.packed_params = _pack_params(
            self.action_params, self.value_params,
            own_obs_dim, obs_flat_dim, num_outputs, hidden)
        self._model_in = None
        self._value_out = None

        self._fwd = jax.jit(functools.partial(
            _fused_forward,
            packed_params=self.packed_params,
            own_dim=own_obs_dim, flat_dim=obs_flat_dim,
            num_outputs=num_outputs, batch_tile=batch_tile))

    def forward(self, input_dict, state=None, seq_lens=None):
        # Stash obs_flat like the torch module; value is computed in the same
        # fused kernel call (identical result, one launch instead of two).
        self._model_in = [input_dict["obs_flat"], state, seq_lens]
        logits, value = self._fwd(input_dict["obs"]["own_obs"], input_dict["obs_flat"])
        self._value_out = value
        return logits, state

    def value_function(self):
        return jnp.reshape(self._value_out, (-1,))


# ----------------------------------------------------------------------------
# Pure-JAX reference (unpacked weights) for correctness checking
# ----------------------------------------------------------------------------
def _mlp3_ref(x, params):
    w1, b1, w2, b2, w3, b3 = params
    h1 = jnp.tanh(x @ w1 + b1)
    h2 = jnp.tanh(h1 @ w2 + b2)
    return h2 @ w3 + b3


if __name__ == "__main__":
    # Small synthetic shapes consistent with the module's forward:
    #   own_obs: (B, OWN), opponent_obs: (B, OPP), obs_flat: (B, OWN + OPP)
    B, OWN, OPP = 8, 16, 16
    NUM_OUTPUTS, HIDDEN = 8, 32

    key = jax.random.PRNGKey(0)
    k_own, k_opp, k_big = jax.random.split(key, 3)
    own_obs = jax.random.uniform(k_own, (B, OWN), jnp.float32, minval=-1.0, maxval=1.0)
    opp_obs = jax.random.uniform(k_opp, (B, OPP), jnp.float32, minval=-1.0, maxval=1.0)
    obs_flat = jnp.concatenate([own_obs, opp_obs], axis=-1)

    input_dict = {
        "obs": {"own_obs": own_obs, "opponent_obs": opp_obs},
        "obs_flat": obs_flat,
    }

    model = CentralizedCriticModelPallas(
        own_obs_dim=OWN, obs_flat_dim=OWN + OPP,
        num_outputs=NUM_OUTPUTS, hidden=HIDDEN, seed=0,
    )

    logits, _ = model.forward(input_dict, state=[], seq_lens=None)
    values = model.value_function()
    jax.block_until_ready((logits, values))

    logits_ref = _mlp3_ref(own_obs, model.action_params)
    values_ref = _mlp3_ref(obs_flat, model.value_params).reshape(-1)
    assert logits.shape == (B, NUM_OUTPUTS)
    assert values.shape == (B,)
    assert jnp.allclose(logits, logits_ref, rtol=1e-4, atol=1e-4)
    assert jnp.allclose(values, values_ref, rtol=1e-4, atol=1e-4)

    # Exercise the batch-tiled ("parallel" grid) path with a larger batch.
    B2 = 300
    k_own2, k_opp2 = jax.random.split(k_big)
    own2 = jax.random.uniform(k_own2, (B2, OWN), jnp.float32, minval=-1.0, maxval=1.0)
    opp2 = jax.random.uniform(k_opp2, (B2, OPP), jnp.float32, minval=-1.0, maxval=1.0)
    flat2 = jnp.concatenate([own2, opp2], axis=-1)

    big_fwd = jax.jit(functools.partial(
        _fused_forward, packed_params=model.packed_params,
        own_dim=OWN, flat_dim=OWN + OPP,
        num_outputs=NUM_OUTPUTS, batch_tile=128))
    logits2, values2 = big_fwd(own2, flat2)
    jax.block_until_ready((logits2, values2))

    assert logits2.shape == (B2, NUM_OUTPUTS)
    assert values2.shape == (B2,)
    assert jnp.allclose(logits2, _mlp3_ref(own2, model.action_params),
                        rtol=1e-4, atol=1e-4)
    assert jnp.allclose(values2, _mlp3_ref(flat2, model.value_params).reshape(-1),
                        rtol=1e-4, atol=1e-4)

    print("KERNEL_OK")
</pallas_src>

<mosaic_0001>
module attributes {stable_mosaic.version = 11 : i64} {
  func.func @_mlp3_kernel(%arg0: memref<8x128xf32, #tpu.memory_space<vmem>>, %arg1: memref<128x256xf32, #tpu.memory_space<vmem>>, %arg2: memref<1x256xf32, #tpu.memory_space<vmem>>, %arg3: memref<256x256xf32, #tpu.memory_space<vmem>>, %arg4: memref<1x256xf32, #tpu.memory_space<vmem>>, %arg5: memref<256x128xf32, #tpu.memory_space<vmem>>, %arg6: memref<1x128xf32, #tpu.memory_space<vmem>>, %arg7: memref<8x128xf32, #tpu.memory_space<vmem>>) attributes {dimension_semantics = [], scalar_prefetch = 0 : i64, scratch_operands = 0 : i64, tpu.core_type = #tpu.core_type<tc>} {
    %c0 = arith.constant 0 : index
    %c0_0 = arith.constant 0 : index
    %0 = vector.load %arg0[%c0, %c0_0] : memref<8x128xf32, #tpu.memory_space<vmem>>, vector<8x128xf32>
    %c0_1 = arith.constant 0 : index
    %c0_2 = arith.constant 0 : index
    %1 = vector.load %arg1[%c0_1, %c0_2] : memref<128x256xf32, #tpu.memory_space<vmem>>, vector<128x256xf32>
    %cst = arith.constant dense<0.000000e+00> : vector<8x256xf32>
    %2 = tpu.matmul %0, %1, %cst {dimension_numbers = #tpu.dot_dimension_numbers<[1], [0], [0], [1], [0, 0, 1, 1], [], []>} : vector<8x128xf32>, vector<128x256xf32>, vector<8x256xf32> -> vector<8x256xf32>
    %c0_3 = arith.constant 0 : index
    %c0_4 = arith.constant 0 : index
    %3 = vector.load %arg2[%c0_3, %c0_4] : memref<1x256xf32, #tpu.memory_space<vmem>>, vector<1x256xf32>
    %4 = vector.broadcast %3 : vector<1x256xf32> to vector<8x256xf32>
    %5 = arith.addf %2, %4 : vector<8x256xf32>
    %6 = math.tanh %5 : vector<8x256xf32>
    %c0_5 = arith.constant 0 : index
    %c0_6 = arith.constant 0 : index
    %7 = vector.load %arg3[%c0_5, %c0_6] : memref<256x256xf32, #tpu.memory_space<vmem>>, vector<256x256xf32>
    %cst_7 = arith.constant dense<0.000000e+00> : vector<8x256xf32>
    %8 = tpu.matmul %6, %7, %cst_7 {dimension_numbers = #tpu.dot_dimension_numbers<[1], [0], [0], [1], [0, 0, 1, 1], [], []>} : vector<8x256xf32>, vector<256x256xf32>, vector<8x256xf32> -> vector<8x256xf32>
    %c0_8 = arith.constant 0 : index
    %c0_9 = arith.constant 0 : index
    %9 = vector.load %arg4[%c0_8, %c0_9] : memref<1x256xf32, #tpu.memory_space<vmem>>, vector<1x256xf32>
    %10 = vector.broadcast %9 : vector<1x256xf32> to vector<8x256xf32>
    %11 = arith.addf %8, %10 : vector<8x256xf32>
    %12 = math.tanh %11 : vector<8x256xf32>
    %c0_10 = arith.constant 0 : index
    %c0_11 = arith.constant 0 : index
    %13 = vector.load %arg5[%c0_10, %c0_11] : memref<256x128xf32, #tpu.memory_space<vmem>>, vector<256x128xf32>
    %cst_12 = arith.constant dense<0.000000e+00> : vector<8x128xf32>
    %14 = tpu.matmul %12, %13, %cst_12 {dimension_numbers = #tpu.dot_dimension_numbers<[1], [0], [0], [1], [0, 0, 1, 1], [], []>} : vector<8x256xf32>, vector<256x128xf32>, vector<8x128xf32> -> vector<8x128xf32>
    %c0_13 = arith.constant 0 : index
    %c0_14 = arith.constant 0 : index
    %15 = vector.load %arg6[%c0_13, %c0_14] : memref<1x128xf32, #tpu.memory_space<vmem>>, vector<1x128xf32>
    %16 = vector.broadcast %15 : vector<1x128xf32> to vector<8x128xf32>
    %17 = arith.addf %14, %16 : vector<8x128xf32>
    %c0_15 = arith.constant 0 : index
    %c0_16 = arith.constant 0 : index
    %18 = vector.load %arg7[%c0_15, %c0_16] : memref<8x128xf32, #tpu.memory_space<vmem>>, vector<8x128xf32>
    tpu.vector_store %arg7[%c0_15, %c0_16], %17 {strides = array<i32>} : memref<8x128xf32, #tpu.memory_space<vmem>>, vector<8x128xf32>,
    return
  }
}

</mosaic_0001>

<bundles_post_ra>
// kernel: _fused_forward.1
= control target key start
LH: loop header
LB: loop body
LE: loop exit
PB: predicated region body
PF: predicated region fallthrough
CT: control target
= control target key end

     0   :  { %12 = vsyncpa [#allocation3], 0  ;;  %s806_s0 = inlined_call_operand.vmem [shape: f32[8,128], index: 0, kind: input, shape index: {}]   ;;  %s807_s1 = inlined_call_operand.hbm [shape: f32[128,256], index: 1, kind: input, shape index: {}]   ;;  %s808_s2 = inlined_call_operand.vmem [shape: f32[1,256], index: 2, kind: input, shape index: {}]   ;;  %s809_s3 = inlined_call_operand.hbm [shape: f32[256,256], index: 3, kind: input, shape index: {}]   ;;  %s810_s4 = inlined_call_operand.vmem [shape: f32[1,256], index: 4, kind: input, shape index: {}]   ;;  %s811_s5 = inlined_call_operand.hbm [shape: f32[256,128], index: 5, kind: input, shape index: {}]   ;;  %s812_s6 = inlined_call_operand.vmem [shape: f32[1,128], index: 6, kind: input, shape index: {}]   ;;  %s813_s7 = inlined_call_operand.vmem [shape: f32[8,128], index: 7, kind: output, shape index: {}]  }
   0x1   :  { %13 = vsyncpa [#allocation5], 0  ;;  %s700_s24 = smov [#allocation4]   ;;  %s701_s26 = smov [#allocation2]  }
   0x2   :  { %s35_s25 = sshll.u32 %s700_s24, 4  ;;  %s21_s27 = sshll.u32 %s701_s26, 4  ;;  %s36_s25 = int_to_ptr.vmem [resolvable:$true] %s35_s25  ;;  %s748_s27 = int_to_ptr.vmem [resolvable:$true] %s21_s27 }
   0x3   :  { %s630_s30 = scalar_lea.hbm %s809_s3, 8192 }
   0x4   :  { %p631_p0 = scmp.ne.s32.totalorder %s809_s3, %s630_s30  ;;  %p634_p1 = scmp.lt.u32.totalorder %s630_s30, %s809_s3 }
   0x6   :  { %p636_p2 = pnand %p634_p1, %p631_p0 }
   0x8   :  { %639 = shalt.err (!%p636_p2)
}
   0x9   :  { %s640_s12 = scalar_lea.vmem %s36_s25, 8192  ;;  %p645_p4 = scmp.lt.s32.totalorder %s36_s25, %s36_s25 }
   0xa   :  { %p641_p3 = scmp.ne.s32.totalorder %s36_s25, %s640_s12  ;;  %p646_p5 = scmp.lt.s32.totalorder %s640_s12, %s640_s12 }
   0xc   :  { %p647_p6 = por %p646_p5, %p645_p4 }
   0xe   :  { %p648_p7 = pnand %p647_p6, %p641_p3 }
  0x10   :  { %651 = shalt.err (!%p648_p7)
}
  0x11   :  { %s702_s13 = smov 256   ;;  %s703_s14 = smov 16  }
  0x12   :  { %41 = dma.hbm_to_vmem [thread:$0]  %s809_s3, 8192, %s36_s25, [#allocation5], %s702_s13, %s702_s13, %s703_s14  }
  0x13   :  { %s652_s19 = scalar_lea.hbm %s807_s1, 4096 }
  0x14   :  { %p653_p8 = scmp.ne.s32.totalorder %s807_s1, %s652_s19  ;;  %p656_p9 = scmp.lt.u32.totalorder %s652_s19, %s807_s1 }
  0x16   :  { %p658_p10 = pnand %p656_p9, %p653_p8 }
  0x18   :  { %661 = shalt.err (!%p658_p10)
}
  0x19   :  { %s662_s24 = scalar_lea.vmem %s748_s27, 4096  ;;  %p667_p12 = scmp.lt.s32.totalorder %s748_s27, %s748_s27 }
  0x1a   :  { %p663_p11 = scmp.ne.s32.totalorder %s748_s27, %s662_s24  ;;  %p668_p13 = scmp.lt.s32.totalorder %s662_s24, %s662_s24 }
  0x1c   :  { %p669_p0 = por %p668_p13, %p667_p12 }
  0x1e   :  { %p670_p1 = pnand %p669_p0, %p663_p11 }
  0x20   :  { %673 = shalt.err (!%p670_p1)
}
  0x21   :  { %27 = dma.hbm_to_vmem [thread:$0]  %s807_s1, 4096, %s748_s27, [#allocation3], %s702_s13, %s702_s13, %s703_s14  }
  0x22   :  { %s704_s26 = smov [#allocation6]   ;;  %s674_s8 = scalar_lea.hbm %s811_s5, 4096 }
  0x23   :  { %s49_s28 = sshll.u32 %s704_s26, 4  ;;  %p675_p2 = scmp.ne.s32.totalorder %s811_s5, %s674_s8  ;;  %s50_s28 = int_to_ptr.vmem [resolvable:$true] %s49_s28 }
  0x24   :  { %p678_p3 = scmp.lt.u32.totalorder %s674_s8, %s811_s5 }
  0x26   :  { %p680_p4 = pnand %p678_p3, %p675_p2 }
  0x28   :  { %683 = shalt.err (!%p680_p4)
}
  0x29   :  { %s684_s15 = scalar_lea.vmem %s50_s28, 4096  ;;  %p689_p6 = scmp.lt.s32.totalorder %s50_s28, %s50_s28 }
  0x2a   :  { %p685_p5 = scmp.ne.s32.totalorder %s50_s28, %s684_s15  ;;  %p690_p7 = scmp.lt.s32.totalorder %s684_s15, %s684_s15 }
  0x2c   :  { %p691_p8 = por %p690_p7, %p689_p6 }
  0x2e   :  { %p692_p9 = pnand %p691_p8, %p685_p5 }
  0x30   :  { %695 = shalt.err (!%p692_p9)
}
  0x31   :  { %s705_s1 = smov 128   ;;  %s706_s27 = smov 8  }
  0x32   :  { %55 = dma.hbm_to_vmem [thread:$0]  %s811_s5, 4096, %s50_s28, [#allocation5], %s705_s1, %s705_s1, %s706_s27  }
  0x33   :  { %696 = dma.done.wait [#allocation3], 4096  }
  0x34   :  { %697 = vsyncadd [#allocation3], 4294963200 }
  0x35   :  { %698 = dma.done.wait [#allocation5], 12288  }
  0x36   :  { %699 = vsyncadd [#allocation5], 4294955008  ;;  %v707_v0 = vmov 0.0   ;;  %v69_v1 = vld [vmem:[#allocation2 + $0x8] sm:$0xff]  ;;  %v71_v2 = vld [vmem:[#allocation2 + $0x18] sm:$0xff] }
  0x37   :  { %176 = vmatprep.mubr.f32.mxu0 %v707_v0  ;;  %v68_v3 = vld [vmem:[#allocation2] sm:$0xff]  ;;  %v486_v4 = vpack.c.bf16 %v71_v2, %v69_v1  ;;  %v70_v5 = vld [vmem:[#allocation2 + $0x10] sm:$0xff]  ;;  %v73_v6 = vld [vmem:[#allocation2 + $0x28] sm:$0xff] }
  0x38   :  { %v75_v7 = vld [vmem:[#allocation2 + $0x38] sm:$0xff]  ;;  %v488_v8 = vpack.c.bf16 %v70_v5, %v68_v3  ;;  %v72_v10 = vld [vmem:[#allocation2 + $0x20] sm:$0xff]  ;;  %v74_v11 = vld [vmem:[#allocation2 + $0x30] sm:$0xff] }
  0x39   :  { %v490_v9 = vpack.c.bf16 %v75_v7, %v73_v6  ;;  %v77_v12 = vld [vmem:[#allocation2 + $0x48] sm:$0xff]  ;;  %487 = vmatprep.subr.bf16.mxu0 %v486_v4  ;;  %v79_v13 = vld [vmem:[#allocation2 + $0x58] sm:$0xff]  ;;  %v492_v14 = vpack.c.bf16 %v74_v11, %v72_v10  ;;  %v76_v16 = vld [vmem:[#allocation2 + $0x40] sm:$0xff] }
  0x3a   :  { %489 = vmatpush1.bf16.msra.mxu0 %v488_v8  ;;  %v494_v15 = vpack.c.bf16 %v79_v13, %v77_v12  ;;  %v78_v17 = vld [vmem:[#allocation2 + $0x50] sm:$0xff]  ;;  %v81_v18 = vld [vmem:[#allocation2 + $0x68] sm:$0xff]  ;;  %v83_v19 = vld [vmem:[#allocation2 + $0x78] sm:$0xff] }
  0x3b   :  { %491 = vmatprep.subr.bf16.mxu0 %v490_v9  ;;  %v496_v20 = vpack.c.bf16 %v78_v17, %v76_v16  ;;  %v498_v21 = vpack.c.bf16 %v83_v19, %v81_v18  ;;  %v80_v22 = vld [vmem:[#allocation2 + $0x60] sm:$0xff]  ;;  %v82_v23 = vld [vmem:[#allocation2 + $0x70] sm:$0xff]  ;;  %v85_v24 = vld [vmem:[#allocation2 + $0x88] sm:$0xff] }
  0x3c   :  { %v87_v25 = vld [vmem:[#allocation2 + $0x98] sm:$0xff]  ;;  %v84_v26 = vld [vmem:[#allocation2 + $0x80] sm:$0xff]  ;;  %v86_v27 = vld [vmem:[#allocation2 + $0x90] sm:$0xff]  ;;  %v500_v31 = vpack.c.bf16 %v82_v23, %v80_v22 }
  0x3d   :  { %v186_v28 = vld [vmem:[#allocation4 + $0x8] sm:$0xff]  ;;  %v188_v29 = vld [vmem:[#allocation4 + $0x18] sm:$0xff]  ;;  %v185_v30 = vld [vmem:[#allocation4] sm:$0xff]  ;;  %v502_v36 = vpack.c.bf16 %v87_v25, %v85_v24  ;;  %v504_v46 = vpack.c.bf16 %v86_v27, %v84_v26 }
  0x3e   :  { %493 = vmatpush1.bf16.msra.mxu0 %v492_v14  ;;  %v518_v32 = vpack.c.bf16 %v188_v29, %v186_v28  ;;  %v187_v33 = vld [vmem:[#allocation4 + $0x10] sm:$0xff]  ;;  %v190_v34 = vld [vmem:[#allocation4 + $0x28] sm:$0xff]  ;;  %v192_v35 = vld [vmem:[#allocation4 + $0x38] sm:$0xff] }
  0x3f   :  { %495 = vmatprep.subr.bf16.mxu0 %v494_v15  ;;  %v520_v37 = vpack.c.bf16 %v187_v33, %v185_v30  ;;  %v522_v38 = vpack.c.bf16 %v192_v35, %v190_v34  ;;  %v189_v39 = vld [vmem:[#allocation4 + $0x20] sm:$0xff]  ;;  %v191_v40 = vld [vmem:[#allocation4 + $0x30] sm:$0xff]  ;;  %v194_v41 = vld [vmem:[#allocation4 + $0x48] sm:$0xff] }
  0x40   :  { %v89_v42 = vld [vmem:[#allocation2 + $0xa8] sm:$0xff]  ;;  %v91_v43 = vld [vmem:[#allocation2 + $0xb8] sm:$0xff]  ;;  %519 = vmatprep.subr.bf16.mxu1 %v518_v32  ;;  %v524_v45 = vpack.c.bf16 %v191_v40, %v189_v39  ;;  %v88_v47 = vld [vmem:[#allocation2 + $0xa0] sm:$0xff] }
  0x41   :  { %v196_v44 = vld [vmem:[#allocation4 + $0x58] sm:$0xff]  ;;  %521 = vmatpush1.bf16.msra.mxu1 %v520_v37  ;;  %v193_v49 = vld [vmem:[#allocation4 + $0x40] sm:$0xff]  ;;  %v195_v50 = vld [vmem:[#allocation4 + $0x50] sm:$0xff]  ;;  %v506_v51 = vpack.c.bf16 %v91_v43, %v89_v42 }
  0x42   :  { %497 = vmatpush1.bf16.msra.mxu0 %v496_v20  ;;  %523 = vmatprep.subr.bf16.mxu1 %v522_v38  ;;  %v526_v48 = vpack.c.bf16 %v196_v44, %v194_v41  ;;  %v90_v52 = vld [vmem:[#allocation2 + $0xb0] sm:$0xff]  ;;  %v198_v53 = vld [vmem:[#allocation4 + $0x68] sm:$0xff]  ;;  %v200_v54 = vld [vmem:[#allocation4 + $0x78] sm:$0xff]  ;;  %v528_v57 = vpack.c.bf16 %v195_v50, %v193_v49 }
  0x43   :  { %499 = vmatprep.subr.bf16.mxu0 %v498_v21  ;;  %v93_v55 = vld [vmem:[#allocation2 + $0xc8] sm:$0xff]  ;;  %v95_v56 = vld [vmem:[#allocation2 + $0xd8] sm:$0xff]  ;;  %v508_v58 = vpack.c.bf16 %v90_v52, %v88_v47  ;;  %v92_v59 = vld [vmem:[#allocation2 + $0xc0] sm:$0xff]  ;;  %v530_v60 = vpack.c.bf16 %v200_v54, %v198_v53 }
  0x44   :  { %v197_v61 = vld [vmem:[#allocation4 + $0x60] sm:$0xff]  ;;  %v199_v62 = vld [vmem:[#allocation4 + $0x70] sm:$0xff]  ;;  %v510_v63 = vpack.c.bf16 %v95_v56, %v93_v55  ;;  %v202_v1 = vld [vmem:[#allocation4 + $0x88] sm:$0xff] }
  0x45   :  { %525 = vmatpush1.bf16.msra.mxu1 %v524_v45  ;;  %v94_v0 = vld [vmem:[#allocation2 + $0xd0] sm:$0xff]  ;;  %v204_v2 = vld [vmem:[#allocation4 + $0x98] sm:$0xff]  ;;  %v97_v3 = vld [vmem:[#allocation2 + $0xe8] sm:$0xff]  ;;  %v532_v5 = vpack.c.bf16 %v199_v62, %v197_v61 }
  0x46   :  { %501 = vmatpush1.bf16.msra.mxu0 %v500_v31  ;;  %527 = vmatprep.subr.bf16.mxu1 %v526_v48  ;;  %v99_v4 = vld [vmem:[#allocation2 + $0xf8] sm:$0xff]  ;;  %v512_v6 = vpack.c.bf16 %v94_v0, %v92_v59  ;;  %v96_v7 = vld [vmem:[#allocation2 + $0xe0] sm:$0xff]  ;;  %v534_v8 = vpack.c.bf16 %v204_v2, %v202_v1  ;;  %v203_v10 = vld [vmem:[#allocation4 + $0x90] sm:$0xff] }
  0x47   :  { %503 = vmatprep.subr.bf16.mxu0 %v502_v36  ;;  %v201_v9 = vld [vmem:[#allocation4 + $0x80] sm:$0xff]  ;;  %v514_v11 = vpack.c.bf16 %v99_v4, %v97_v3  ;;  %v98_v12 = vld [vmem:[#allocation2 + $0xf0] sm:$0xff]  ;;  %v206_v13 = vld [vmem:[#allocation4 + $0xa8] sm:$0xff] }
  0x48   :  { %v208_v14 = vld [vmem:[#allocation4 + $0xb8] sm:$0xff]  ;;  %v536_v15 = vpack.c.bf16 %v203_v10, %v201_v9  ;;  %v516_v16 = vpack.c.bf16 %v98_v12, %v96_v7  ;;  %v205_v18 = vld [vmem:[#allocation4 + $0xa0] sm:$0xff]  ;;  %v207_v19 = vld [vmem:[#allocation4 + $0xb0] sm:$0xff] }
  0x49   :  { %529 = vmatpush1.bf16.msra.mxu1 %v528_v57  ;;  %v538_v17 = vpack.c.bf16 %v208_v14, %v206_v13  ;;  %v210_v20 = vld [vmem:[#allocation4 + $0xc8] sm:$0xff]  ;;  %v212_v21 = vld [vmem:[#allocation4 + $0xd8] sm:$0xff]  ;;  %v540_v22 = vpack.c.bf16 %v207_v19, %v205_v18  ;;  %v67_v23 = vld [vmem:[%s806_s0] sm:$0xff] }
  0x4a   :  { %505 = vmatpush1.bf16.msra.mxu0 %v504_v46  ;;  %531 = vmatprep.subr.bf16.mxu1 %v530_v60  ;;  %v542_v24 = vpack.c.bf16 %v212_v21, %v210_v20  ;;  %v209_v25 = vld [vmem:[#allocation4 + $0xc0] sm:$0xff]  ;;  %v211_v26 = vld [vmem:[#allocation4 + $0xd0] sm:$0xff]  ;;  %v214_v27 = vld [vmem:[#allocation4 + $0xe8] sm:$0xff] }
  0x4b   :  { %507 = vmatprep.subr.bf16.mxu0 %v506_v51  ;;  %v216_v28 = vld [vmem:[#allocation4 + $0xf8] sm:$0xff]  ;;  %v544_v29 = vpack.c.bf16 %v211_v26, %v209_v25  ;;  %v213_v31 = vld [vmem:[#allocation4 + $0xe0] sm:$0xff]  ;;  %v215_v32 = vld [vmem:[#allocation4 + $0xf0] sm:$0xff] }
  0x4c   :  { %v546_v30 = vpack.c.bf16 %v216_v28, %v214_v27  ;;  %v218_v33 = vld [vmem:[#allocation4 + $0x108] sm:$0xff]  ;;  %v220_v34 = vld [vmem:[#allocation4 + $0x118] sm:$0xff]  ;;  %v548_v35 = vpack.c.bf16 %v215_v32, %v213_v31  ;;  %v217_v37 = vld [vmem:[#allocation4 + $0x100] sm:$0xff] }
  0x4d   :  { %533 = vmatpush1.bf16.msra.mxu1 %v532_v5  ;;  %v550_v36 = vpack.c.bf16 %v220_v34, %v218_v33  ;;  %v219_v38 = vld [vmem:[#allocation4 + $0x110] sm:$0xff]  ;;  %v222_v39 = vld [vmem:[#allocation4 + $0x128] sm:$0xff]  ;;  %v224_v40 = vld [vmem:[#allocation4 + $0x138] sm:$0xff] }
  0x4e   :  { %509 = vmatpush1.bf16.msra.mxu0 %v508_v58  ;;  %535 = vmatprep.subr.bf16.mxu1 %v534_v8  ;;  %v552_v41 = vpack.c.bf16 %v219_v38, %v217_v37  ;;  %v554_v42 = vpack.c.bf16 %v224_v40, %v222_v39  ;;  %v221_v43 = vld [vmem:[#allocation4 + $0x120] sm:$0xff]  ;;  %v223_v44 = vld [vmem:[#allocation4 + $0x130] sm:$0xff]  ;;  %v226_v45 = vld [vmem:[#allocation4 + $0x148] sm:$0xff] }
  0x4f   :  { %511 = vmatprep.subr.bf16.mxu0 %v510_v63  ;;  %v228_v46 = vld [vmem:[#allocation4 + $0x158] sm:$0xff]  ;;  %v556_v47 = vpack.c.bf16 %v223_v44, %v221_v43  ;;  %v225_v49 = vld [vmem:[#allocation4 + $0x140] sm:$0xff]  ;;  %v227_v50 = vld [vmem:[#allocation4 + $0x150] sm:$0xff] }
  0x50   :  { %v558_v48 = vpack.c.bf16 %v228_v46, %v226_v45  ;;  %v230_v51 = vld [vmem:[#allocation4 + $0x168] sm:$0xff]  ;;  %v232_v52 = vld [vmem:[#allocation4 + $0x178] sm:$0xff]  ;;  %v560_v53 = vpack.c.bf16 %v227_v50, %v225_v49  ;;  %v229_v55 = vld [vmem:[#allocation4 + $0x160] sm:$0xff] }
  0x51   :  { %537 = vmatpush1.bf16.msra.mxu1 %v536_v15  ;;  %v562_v54 = vpack.c.bf16 %v232_v52, %v230_v51  ;;  %v231_v56 = vld [vmem:[#allocation4 + $0x170] sm:$0xff]  ;;  %v234_v58 = vld [vmem:[#allocation4 + $0x188] sm:$0xff]  ;;  %v236_v59 = vld [vmem:[#allocation4 + $0x198] sm:$0xff] }
  0x52   :  { %513 = vmatpush1.bf16.msra.mxu0 %v512_v6  ;;  %539 = vmatprep.subr.bf16.mxu1 %v538_v17  ;;  %v564_v57 = vpack.c.bf16 %v231_v56, %v229_v55  ;;  %v566_v60 = vpack.c.bf16 %v236_v59, %v234_v58  ;;  %v233_v61 = vld [vmem:[#allocation4 + $0x180] sm:$0xff]  ;;  %v235_v62 = vld [vmem:[#allocation4 + $0x190] sm:$0xff]  ;;  %v238_v0 = vld [vmem:[#allocation4 + $0x1a8] sm:$0xff] }
  0x53   :  { %515 = vmatprep.subr.bf16.mxu0 %v514_v11  ;;  %v568_v63 = vpack.c.bf16 %v235_v62, %v233_v61  ;;  %v240_v1 = vld [vmem:[#allocation4 + $0x1b8] sm:$0xff]  ;;  %v237_v3 = vld [vmem:[#allocation4 + $0x1a0] sm:$0xff]  ;;  %v239_v4 = vld [vmem:[#allocation4 + $0x1b0] sm:$0xff] }
  0x54   :  { %v570_v2 = vpack.c.bf16 %v240_v1, %v238_v0  ;;  %v572_v5 = vpack.c.bf16 %v239_v4, %v237_v3  ;;  %v242_v6 = vld [vmem:[#allocation4 + $0x1c8] sm:$0xff]  ;;  %v244_v7 = vld [vmem:[#allocation4 + $0x1d8] sm:$0xff]  ;;  %v241_v8 = vld [vmem:[#allocation4 + $0x1c0] sm:$0xff] }
  0x55   :  { %541 = vmatpush1.bf16.msra.mxu1 %v540_v22  ;;  %v574_v9 = vpack.c.bf16 %v244_v7, %v242_v6  ;;  %v243_v10 = vld [vmem:[#allocation4 + $0x1d0] sm:$0xff]  ;;  %v246_v11 = vld [vmem:[#allocation4 + $0x1e8] sm:$0xff]  ;;  %v248_v12 = vld [vmem:[#allocation4 + $0x1f8] sm:$0xff] }
  0x56   :  { %517 = vmatpush1.bf16.msra.mxu0 %v516_v16  ;;  %543 = vmatprep.subr.bf16.mxu1 %v542_v24  ;;  %v576_v13 = vpack.c.bf16 %v243_v10, %v241_v8  ;;  %v578_v14 = vpack.c.bf16 %v248_v12, %v246_v11  ;;  %v245_v15 = vld [vmem:[#allocation4 + $0x1e0] sm:$0xff]  ;;  %v247_v16 = vld [vmem:[#allocation4 + $0x1f0] sm:$0xff]  ;;  %v351_v19 = vld [vmem:[#allocation6 + $0x88] sm:$0xff] }
  0x57   :  { %v580_v17 = vpack.c.bf16 %v247_v16, %v245_v15  ;;  %v350_v18 = vld [vmem:[#allocation6 + $0x80] sm:$0xff]  ;;  %v335_v22 = vld [vmem:[#allocation6 + $0x8] sm:$0xff]  ;;  %v353_v24 = vld [vmem:[#allocation6 + $0x98] sm:$0xff] }
  0x58   :  { %v334_v20 = vld [vmem:[#allocation6] sm:$0xff]  ;;  %v582_v21 = vpack.c.bf16 %v351_v19, %v350_v18  ;;  %v336_v27 = vld [vmem:[#allocation6 + $0x10] sm:$0xff]  ;;  %v337_v28 = vld [vmem:[#allocation6 + $0x18] sm:$0xff] }
  0x59   :  { %177 = vmatmul.mubr.f32.vlgmr.msra.gmra.mrb[0].mxu0 %v67_v23  ;;  %545 = vmatpush1.bf16.msra.mxu1 %v544_v29  ;;  %v352_v23 = vld [vmem:[#allocation6 + $0x90] sm:$0xff]  ;;  %v584_v25 = vpack.c.bf16 %v335_v22, %v334_v20  ;;  %v354_v29 = vld [vmem:[#allocation6 + $0xa0] sm:$0xff]  ;;  %v588_v31 = vpack.c.bf16 %v337_v28, %v336_v27  ;;  %v339_v34 = vld [vmem:[#allocation6 + $0x28] sm:$0xff] }
  0x5a   :  { %547 = vmatprep.subr.bf16.mxu1 %v546_v30  ;;  %v586_v26 = vpack.c.bf16 %v353_v24, %v352_v23  ;;  %583 = vmatprep.subr.bf16.mxu0 %v582_v21  ;;  %v355_v30 = vld [vmem:[#allocation6 + $0xa8] sm:$0xff]  ;;  %v338_v33 = vld [vmem:[#allocation6 + $0x20] sm:$0xff]  ;;  %v340_v39 = vld [vmem:[#allocation6 + $0x30] sm:$0xff] }
  0x5b   :  { %585 = vmatpush3.bf16.msra.mxu0 %v584_v25  ;;  %v590_v32 = vpack.c.bf16 %v355_v30, %v354_v29  ;;  %v592_v37 = vpack.c.bf16 %v339_v34, %v338_v33  ;;  %v341_v40 = vld [vmem:[#allocation6 + $0x38] sm:$0xff]  ;;  %v100_v45 = vld [vmem:[%s808_s2] sm:$0x3]  ;;  %v359_v56 = vld [vmem:[#allocation6 + $0xc8] sm:$0xff] }
  0x5c   :  { %587 = vmatprep.subr.bf16.mxu0 %v586_v26  ;;  %v358_v55 = vld [vmem:[#allocation6 + $0xc0] sm:$0xff]  ;;  %v343_v59 = vld [vmem:[#allocation6 + $0x48] sm:$0xff]  ;;  %v360_v61 = vld [vmem:[#allocation6 + $0xd0] sm:$0xff] }
  0x5d   :  { %549 = vmatpush1.bf16.msra.mxu1 %v548_v35  ;;  %v356_v35 = vld [vmem:[#allocation6 + $0xb0] sm:$0xff]  ;;  %v342_v58 = vld [vmem:[#allocation6 + $0x40] sm:$0xff]  ;;  %v361_v62 = vld [vmem:[#allocation6 + $0xd8] sm:$0xff] }
  0x5e   :  { %551 = vmatprep.subr.bf16.mxu1 %v550_v36  ;;  %v357_v36 = vld [vmem:[#allocation6 + $0xb8] sm:$0xff]  ;;  %v344_v0 = vld [vmem:[#allocation6 + $0x50] sm:$0xff]  ;;  %v362_v3 = vld [vmem:[#allocation6 + $0xe0] sm:$0xff] }
  0x5f   :  { %589 = vmatpush3.bf16.msra.mxu0 %v588_v31  ;;  %v594_v38 = vpack.c.bf16 %v357_v36, %v356_v35  ;;  %v345_v1 = vld [vmem:[#allocation6 + $0x58] sm:$0xff]  ;;  %v363_v4 = vld [vmem:[#allocation6 + $0xe8] sm:$0xff]  ;;  %v364_v8 = vld [vmem:[#allocation6 + $0xf0] sm:$0xff] }
  0x60   :  { %591 = vmatprep.subr.bf16.mxu0 %v590_v32  ;;  %v606_v6 = vpack.c.bf16 %v363_v4, %v362_v3  ;;  %v347_v7 = vld [vmem:[#allocation6 + $0x68] sm:$0xff]  ;;  %v348_v12 = vld [vmem:[#allocation6 + $0x70] sm:$0xff]  ;;  %v249_v15 = vld [vmem:[%s810_s4] sm:$0x3] }
  0x61   :  { %553 = vmatpush1.bf16.msra.mxu1 %v552_v41  ;;  %v596_v41 = vpack.c.bf16 %v341_v40, %v340_v39  ;;  %v450_v25 = vld [vmem:[%s812_s6] ss:$0 sm:$0xff] }
  0x62   :  { %555 = vmatprep.subr.bf16.mxu1 %v554_v42  ;;  %v102_v42 = vlaneseq }
  0x63   :  { %593 = vmatpush3.bf16.msra.mxu0 %v592_v37 }
  0x64   :  { %595 = vmatprep.subr.bf16.mxu0 %v594_v38  ;;  %v103_v43 = vshrl.u32 %v102_v42, 7 }
  0x65   :  { %557 = vmatpush1.bf16.msra.mxu1 %v556_v47 }
  0x66   :  { %559 = vmatprep.subr.bf16.mxu1 %v558_v48  ;;  %v104_v44 = vsub.s32 0, %v103_v43  ;;  %v108_v46 = vsub.s32 1, %v103_v43 }
  0x67   :  { %597 = vmatpush3.bf16.msra.mxu0 %v596_v41 }
  0x68   :  { %v105_v47 = vrot.slane %v100_v45, %v104_v44  ;;  %v109_v48 = vrot.slane %v100_v45, %v108_v46  ;;  %v254_v16 = vrot.slane %v249_v15, %v104_v44 }
  0x69   :  { %561 = vmatpush1.bf16.msra.mxu1 %v560_v53 }
  0x6a   :  { %563 = vmatprep.subr.bf16.mxu1 %v562_v54 }
  0x6d   :  { %565 = vmatpush1.bf16.msra.mxu1 %v564_v57  ;;  %v598_v57 = vpack.c.bf16 %v359_v56, %v358_v55 }
  0x6e   :  { %567 = vmatprep.subr.bf16.mxu1 %v566_v60  ;;  %v600_v60 = vpack.c.bf16 %v343_v59, %v342_v58 }
  0x6f   :  { %599 = vmatprep.subr.bf16.mxu0 %v598_v57 }
  0x70   :  { %601 = vmatpush3.bf16.msra.mxu0 %v600_v60 }
  0x71   :  { %569 = vmatpush1.bf16.msra.mxu1 %v568_v63  ;;  %v602_v63 = vpack.c.bf16 %v361_v62, %v360_v61 }
  0x72   :  { %571 = vmatprep.subr.bf16.mxu1 %v570_v2  ;;  %v604_v2 = vpack.c.bf16 %v345_v1, %v344_v0 }
  0x73   :  { %603 = vmatprep.subr.bf16.mxu0 %v602_v63 }
  0x74   :  { %605 = vmatpush3.bf16.msra.mxu0 %v604_v2 }
  0x75   :  { %573 = vmatpush1.bf16.msra.mxu1 %v572_v5  ;;  %v346_v5 = vld [vmem:[#allocation6 + $0x60] sm:$0xff]  ;;  %607 = vmatprep.subr.bf16.mxu0 %v606_v6 }
  0x76   :  { %575 = vmatprep.subr.bf16.mxu1 %v574_v9  ;;  %v365_v9 = vld [vmem:[#allocation6 + $0xf8] sm:$0xff]  ;;  %v608_v10 = vpack.c.bf16 %v347_v7, %v346_v5 }
  0x77   :  { %v610_v11 = vpack.c.bf16 %v365_v9, %v364_v8 }
  0x78   :  { %609 = vmatpush3.bf16.msra.mxu0 %v608_v10 }
  0x79   :  { %577 = vmatpush1.bf16.msra.mxu1 %v576_v13  ;;  %v349_v13 = vld [vmem:[#allocation6 + $0x78] sm:$0xff]  ;;  %611 = vmatprep.subr.bf16.mxu0 %v610_v11 }
  0x7a   :  { %579 = vmatprep.subr.bf16.mxu1 %v578_v14  ;;  %v612_v14 = vpack.c.bf16 %v349_v13, %v348_v12 }
  0x7c   :  { %613 = vmatpush3.bf16.msra.mxu0 %v612_v14 }
  0x7d   :  { %581 = vmatpush1.bf16.msra.mxu1 %v580_v17  ;;  %v258_v17 = vrot.slane %v249_v15, %v108_v46 }
 0x12c   :  { %v178_v49 = vpop.f32.mrb[0].mxu0 }
 0x12d   :  { %v179_v50 = vadd.f32 %v178_v49, %v105_v47  ;;  %v180_v51 = vpop.f32.mrb[1].mxu0 }
 0x12e   :  { %v181_v52 = vadd.f32 %v180_v51, %v109_v48 }
 0x130   :  { %622 = vtanh.f32 %v181_v52 }
 0x131   :  { %624 = vtanh.f32 %v179_v50 }
 0x13a   :  { %v623_v53 = vpop.eup %622 }
 0x13b   :  { %v625_v54 = vpop.eup %624  ;;  %325 = vmatprep.mubr.f32.mxu1 %v623_v53 }
 0x13c   :  { %326 = vmatmul.mubr.f32.vlgmr.msra.gmra.mrb[0].mxu1 %v625_v54 }
 0x20f   :  { %v327_v18 = vpop.f32.mrb[0].mxu1 }
 0x210   :  { %v328_v19 = vadd.f32 %v327_v18, %v254_v16  ;;  %v329_v20 = vpop.f32.mrb[1].mxu1 }
 0x211   :  { %v330_v21 = vadd.f32 %v329_v20, %v258_v17 }
 0x213   :  { %626 = vtanh.f32 %v330_v21 }
 0x214   :  { %628 = vtanh.f32 %v328_v19 }
 0x21d   :  { %v627_v22 = vpop.eup %626 }
 0x21e   :  { %v629_v23 = vpop.eup %628  ;;  %437 = vmatprep.mubr.f32.mxu0 %v627_v22 }
 0x21f   :  { %438 = vmatmul.mubr.f32.vlgmr.msra.gmra.mrb[2].mxu0 %v629_v23 }
 0x2f2   :  { %v483_v24 = vpop.f32.mrb[2].mxu0 }
 0x2f3   :  { %v484_v26 = vpop.f32.mrb[3].mxu0 }
 0x2f4   :  { %v485_v27 = vadd.f32 %v484_v26, %v483_v24 }
 0x2f6   :  { %v440_v28 = vadd.f32 %v485_v27, %v450_v25 }
 0x2f8   :  { %443 = vst [vmem:[%s813_s7] sm:$0xff] %v440_v28 }
 0x2f9   :  { %448 = vsyncpa [#allocation3], 1 }
 0x2fa   :  { %449 = vsyncpa [#allocation5], 1 }

</bundles_post_ra>
